<compile_context>
chip_gen: v6e
topology: v6e:2x2x1
jax: 0.10.0
libtpu: 0.0.40
codegen_flags: <defaults>
</compile_context>

<pallas_src>
import math
import functools

import jax
import jax.numpy as jnp
from jax.experimental import pallas as pl
from jax.experimental.pallas import tpu as pltpu


# ----------------------------- small static helpers -----------------------------

def _cdiv(a, b):
    return -(-a // b)


def _round_up(a, b):
    return _cdiv(a, b) * b


def _next_pow2(n):
    p = 1
    while p < n:
        p *= 2
    return p


def _footprint_bytes(tq, klen):
    """Conservative per-tile VMEM working-set estimate (bytes)."""
    lwp = _round_up(tq + klen, 128)
    # double-buffered (tq, klen) out block + (tq, lwp) scratch + roll/copy
    # temporaries of up to ~(tq, lwp) + small (1..8, lwp) row intermediates.
    return 4 * (2 * tq * klen + 2 * tq * lwp + 32 * lwp) + (1 << 18)


def _pick_tq(qlen, klen, n_heads, budget_bytes):
    """Largest power-of-two q-tile that fits the budget, with a >=4-tile floor."""
    max_tq = max(8, _next_pow2(qlen))
    tq = 8
    while tq * 2 <= max_tq and _footprint_bytes(tq * 2, klen) <= budget_bytes:
        tq *= 2
    # Keep at least ~4 blocks of work when possible so v7x's two TensorCores
    # (grid axes are marked "parallel") both get tiles.
    while tq >= 16 and n_heads * _cdiv(qlen, tq) < 4:
        tq //= 2
    return tq


# --------------------------------- the kernel -----------------------------------

def _rpb_kernel(emb_ref, out_ref, e_ref, *, tq, klen, lwp, num_buckets,
                max_distance, bidirectional):
    """One (head, q-tile) step: writes a (tq, klen) block of the flat bias slab.

    emb_ref : (n_heads, num_buckets) f32 in SMEM — embedding table, transposed.
    out_ref : (tq, klen)             f32 in VMEM — output block.
    e_ref   : (tq, lwp)              f32 VMEM scratch for the Toeplitz expansion.
    """
    h = pl.program_id(0)
    q0 = pl.program_id(1) * tq

    # ---- distance row: bias value for every relative distance this tile needs ----
    # Lane c holds value(rel) with rel(c) = ((c + tq - 1) mod lwp) - (tq - 1) - q0,
    # so output row r of the tile is exactly a circular right-shift of this row by r.
    c = jax.lax.broadcasted_iota(jnp.int32, (1, lwp), 1)
    jj = c + (tq - 1)
    jj = jnp.where(jj >= lwp, jj - lwp, jj)
    rel = jj - (tq - 1) - q0                     # memory_position - query_position

    # _relative_position_bucket, elementwise over ~tq+klen values (NOT Q*K).
    n = -rel
    nb = num_buckets
    if bidirectional:
        nb = nb // 2
        ret = jnp.where(n < 0, nb, 0).astype(jnp.int32)
        n = jnp.abs(n)
    else:
        ret = jnp.zeros_like(n)
        n = jnp.maximum(n, 0)
    max_exact = nb // 2
    is_small = n < max_exact
    # clamp log arg to >=1 only to keep the masked-out branch finite.
    log_ratio = jnp.log(jnp.maximum(n.astype(jnp.float32), 1.0) / float(max_exact))
    val_if_large = max_exact + (
        log_ratio / math.log(max_distance / max_exact) * (nb - max_exact)
    ).astype(jnp.int32)                           # trunc == torch .to(long) for >= 0
    val_if_large = jnp.minimum(val_if_large, nb - 1)
    bucket = ret + jnp.where(is_small, n, val_if_large)   # int32 in [0, num_buckets)

    # bucket -> bias value for head h: num_buckets scalar selects from the SMEM
    # table (replaces the old (num_buckets, tq*klen) one-hot + MXU matmul).
    row = jnp.zeros((1, lwp), jnp.float32)
    for b in range(num_buckets):
        row = jnp.where(bucket == b, emb_ref[h, b], row)

    # ---- Toeplitz expansion: output row r = circular right-shift of `row` by r ----
    # Stage A: first 8 rows via a 3-step binary shifter network (static rolls).
    sub = jax.lax.broadcasted_iota(jnp.int32, (8, lwp), 0)
    blk = jnp.broadcast_to(row, (8, lwp))
    for m in range(3):
        sh = 1 << m
        blk = jnp.where((sub & sh) != 0, pltpu.roll(blk, sh, axis=1), blk)
    e_ref[0:8, :] = blk

    # Stage B: double the materialized rows (8 -> tq) with aligned block writes.
    rows = 8
    while rows < tq:
        e_ref[rows:2 * rows, :] = pltpu.roll(e_ref[0:rows, :], rows, axis=1)
        rows *= 2

    out_ref[...] = e_ref[:, :klen]


# --------------------------------- the wrapper ----------------------------------

def relative_position_bias(emb_weight, qlen, klen, *, num_buckets=32,
                           max_distance=128, bidirectional=True,
                           vmem_budget_bytes=24 * 1024 * 1024):
    """Returns bias of shape (1, n_heads, qlen, klen), matching the PyTorch module.

    vmem_budget_bytes sizes the q-tile.  The 24 MiB default is safe on every
    generation (v7x has 64 MiB VMEM per TensorCore); v5e / v6e (128 MiB VMEM) may
    pass 32-48 MiB for slightly longer HBM store bursts.
    """
    assert emb_weight.shape[0] == num_buckets, "emb_weight must be (num_buckets, n_heads)"
    n_heads = emb_weight.shape[1]

    tq = _pick_tq(qlen, klen, n_heads, vmem_budget_bytes)
    nqt = _cdiv(qlen, tq)
    qlen_p = nqt * tq                       # padded q length (remainder tile)
    lwp = _round_up(tq + klen, 128)

    fp = _footprint_bytes(tq, klen)
    vmem_limit = int(min(max(2 * fp + (2 << 20), 24 << 20), 100 << 20))

    emb_t = jnp.asarray(emb_weight, jnp.float32).T      # (n_heads, num_buckets)

    kernel = functools.partial(
        _rpb_kernel, tq=tq, klen=klen, lwp=lwp, num_buckets=num_buckets,
        max_distance=max_distance, bidirectional=bidirectional)

    flat = pl.pallas_call(
        kernel,
        out_shape=jax.ShapeDtypeStruct((n_heads * qlen_p, klen), jnp.float32),
        grid=(n_heads, nqt),
        in_specs=[pl.BlockSpec(memory_space=pltpu.MemorySpace.SMEM)],
        out_specs=pl.BlockSpec((tq, klen), lambda h, i: (h * nqt + i, 0)),
        scratch_shapes=[pltpu.VMEM((tq, lwp), jnp.float32)],
        compiler_params=pltpu.CompilerParams(
            dimension_semantics=("parallel", "parallel"),
            vmem_limit_bytes=vmem_limit),
    )(emb_t)

    out = flat.reshape(n_heads, qlen_p, klen)    # free, row-major reshape
    if qlen_p != qlen:
        out = out[:, :qlen, :]                   # drop padded remainder rows
    return out[None]                             # (1, n_heads, qlen, klen)


# ------------------------------ pure-JAX reference ------------------------------

def _reference(emb_weight, qlen, klen, num_buckets=32, max_distance=128,
               bidirectional=True):
    """Mirrors the PyTorch module, for a correctness check."""
    ctx = jnp.arange(qlen, dtype=jnp.int32)[:, None]
    mem = jnp.arange(klen, dtype=jnp.int32)[None, :]
    rel = mem - ctx
    n = -rel
    nb = num_buckets
    ret = jnp.zeros_like(n)
    if bidirectional:
        nb //= 2
        ret = ret + (n < 0).astype(jnp.int32) * nb
        n = jnp.abs(n)
    else:
        n = jnp.maximum(n, 0)
    max_exact = nb // 2
    is_small = n < max_exact
    val_if_large = max_exact + (
        jnp.log(jnp.maximum(n.astype(jnp.float32), 1.0) / max_exact)
        / math.log(max_distance / max_exact) * (nb - max_exact)
    ).astype(jnp.int32)
    val_if_large = jnp.minimum(val_if_large, nb - 1)
    bucket = ret + jnp.where(is_small, n, val_if_large)
    values = emb_weight[bucket]                     # (Q, K, H)
    return jnp.transpose(values, (2, 0, 1))[None]   # (1, H, Q, K)


if __name__ == "__main__":
    num_buckets, max_distance, n_heads = 32, 128, 2
    key = jax.random.PRNGKey(0)
    emb_weight = jax.random.normal(key, (num_buckets, n_heads), dtype=jnp.float32)

    # Case 1: module defaults, tiny square problem (bidirectional).
    qlen, klen = 8, 8
    out = relative_position_bias(emb_weight, qlen, klen,
                                 num_buckets=num_buckets,
                                 max_distance=max_distance,
                                 bidirectional=True)
    out = jax.block_until_ready(out)
    ref = _reference(emb_weight, qlen, klen, num_buckets, max_distance, True)
    assert out.shape == (1, n_heads, qlen, klen), out.shape
    assert jnp.allclose(out, ref, atol=1e-6), "mismatch vs reference (bidirectional)"

    # Case 2: non-power-of-two qlen/klen (exercises the padded remainder tile)
    # and the unidirectional bucket path.
    qlen2, klen2 = 24, 20
    out2 = relative_position_bias(emb_weight, qlen2, klen2,
                                  num_buckets=num_buckets,
                                  max_distance=max_distance,
                                  bidirectional=False)
    out2 = jax.block_until_ready(out2)
    ref2 = _reference(emb_weight, qlen2, klen2, num_buckets, max_distance, False)
    assert out2.shape == (1, n_heads, qlen2, klen2), out2.shape
    assert jnp.allclose(out2, ref2, atol=1e-6), "mismatch vs reference (causal)"

    print("KERNEL_OK")
</pallas_src>

<mosaic_0001>
module attributes {stable_mosaic.version = 11 : i64} {
  func.func @_rpb_kernel(%arg0: i32, %arg1: i32, %arg2: memref<2x32xf32, #tpu.memory_space<smem>>, %arg3: memref<8x8xf32, #tpu.memory_space<vmem>>, %arg4: memref<8x128xf32, #tpu.memory_space<vmem>>) attributes {dimension_semantics = [#tpu.dimension_semantics<parallel>, #tpu.dimension_semantics<parallel>], iteration_bounds = array<i64: 2, 1>, scalar_prefetch = 0 : i64, scratch_operands = 1 : i64, tpu.core_type = #tpu.core_type<tc>, window_params = [{transform_indices = @transform_0, window_bounds = array<i64: 2, 32>}, {transform_indices = @transform_1, window_bounds = array<i64: 8, 8>}]} {
    %c8_i32 = arith.constant 8 : i32
    %0 = arith.muli %arg1, %c8_i32 : i32
    %1 = tpu.iota {dimensions = array<i32: 1>} : vector<1x128xi32>
    %c7_i32 = arith.constant 7 : i32
    %2 = vector.broadcast %c7_i32 : i32 to vector<1x128xi32>
    %3 = arith.addi %1, %2 : vector<1x128xi32>
    %c128_i32 = arith.constant 128 : i32
    %4 = vector.broadcast %c128_i32 : i32 to vector<1x128xi32>
    %5 = arith.cmpi sge, %3, %4 : vector<1x128xi32>
    %c128_i32_0 = arith.constant 128 : i32
    %6 = vector.broadcast %c128_i32_0 : i32 to vector<1x128xi32>
    %7 = arith.subi %3, %6 : vector<1x128xi32>
    %8 = arith.select %5, %7, %3 : vector<1x128xi1>, vector<1x128xi32>
    %c7_i32_1 = arith.constant 7 : i32
    %9 = vector.broadcast %c7_i32_1 : i32 to vector<1x128xi32>
    %10 = arith.subi %8, %9 : vector<1x128xi32>
    %11 = vector.broadcast %0 : i32 to vector<1x128xi32>
    %12 = arith.subi %10, %11 : vector<1x128xi32>
    %c0_i32 = arith.constant 0 : i32
    %13 = vector.broadcast %c0_i32 : i32 to vector<1x128xi32>
    %14 = arith.subi %13, %12 : vector<1x128xi32>
    %c0_i32_2 = arith.constant 0 : i32
    %15 = vector.broadcast %c0_i32_2 : i32 to vector<1x128xi32>
    %16 = arith.cmpi slt, %14, %15 : vector<1x128xi32>
    %c16_i32 = arith.constant 16 : i32
    %c0_i32_3 = arith.constant 0 : i32
    %17 = vector.broadcast %c16_i32 : i32 to vector<1x128xi32>
    %18 = vector.broadcast %c0_i32_3 : i32 to vector<1x128xi32>
    %19 = arith.select %16, %17, %18 : vector<1x128xi1>, vector<1x128xi32>
    %20 = math.absi %14 : vector<1x128xi32>
    %c8_i32_4 = arith.constant 8 : i32
    %21 = vector.broadcast %c8_i32_4 : i32 to vector<1x128xi32>
    %22 = arith.cmpi slt, %20, %21 : vector<1x128xi32>
    %23 = arith.sitofp %20 : vector<1x128xi32> to vector<1x128xf32>
    %cst = arith.constant 1.000000e+00 : f32
    %24 = vector.broadcast %cst : f32 to vector<1x128xf32>
    %25 = arith.maximumf %23, %24 : vector<1x128xf32>
    %cst_5 = arith.constant 8.000000e+00 : f32
    %26 = vector.broadcast %cst_5 : f32 to vector<1x128xf32>
    %27 = arith.divf %25, %26 : vector<1x128xf32>
    %28 = math.log %27 : vector<1x128xf32>
    %cst_6 = arith.constant 2.77258873 : f32
    %29 = vector.broadcast %cst_6 : f32 to vector<1x128xf32>
    %30 = arith.divf %28, %29 : vector<1x128xf32>
    %cst_7 = arith.constant 8.000000e+00 : f32
    %31 = vector.broadcast %cst_7 : f32 to vector<1x128xf32>
    %32 = arith.mulf %30, %31 : vector<1x128xf32>
    %33 = arith.fptosi %32 : vector<1x128xf32> to vector<1x128xi32>
    %c8_i32_8 = arith.constant 8 : i32
    %34 = vector.broadcast %c8_i32_8 : i32 to vector<1x128xi32>
    %35 = arith.addi %34, %33 : vector<1x128xi32>
    %c15_i32 = arith.constant 15 : i32
    %36 = vector.broadcast %c15_i32 : i32 to vector<1x128xi32>
    %37 = arith.minsi %35, %36 : vector<1x128xi32>
    %38 = arith.select %22, %20, %37 : vector<1x128xi1>, vector<1x128xi32>
    %39 = arith.addi %19, %38 : vector<1x128xi32>
    %cst_9 = arith.constant 0.000000e+00 : f32
    %40 = vector.broadcast %cst_9 : f32 to vector<1x128xf32>
    %c0_i32_10 = arith.constant 0 : i32
    %41 = vector.broadcast %c0_i32_10 : i32 to vector<1x128xi32>
    %42 = arith.cmpi eq, %39, %41 : vector<1x128xi32>
    %43 = arith.index_cast %arg0 : i32 to index
    %c0 = arith.constant 0 : index
    %44 = memref.load %arg2[%43, %c0] : memref<2x32xf32, #tpu.memory_space<smem>>
    %45 = vector.broadcast %44 : f32 to vector<1x128xf32>
    %46 = arith.select %42, %45, %40 : vector<1x128xi1>, vector<1x128xf32>
    %c1_i32 = arith.constant 1 : i32
    %47 = vector.broadcast %c1_i32 : i32 to vector<1x128xi32>
    %48 = arith.cmpi eq, %39, %47 : vector<1x128xi32>
    %49 = arith.index_cast %arg0 : i32 to index
    %c1 = arith.constant 1 : index
    %50 = memref.load %arg2[%49, %c1] : memref<2x32xf32, #tpu.memory_space<smem>>
    %51 = vector.broadcast %50 : f32 to vector<1x128xf32>
    %52 = arith.select %48, %51, %46 : vector<1x128xi1>, vector<1x128xf32>
    %c2_i32 = arith.constant 2 : i32
    %53 = vector.broadcast %c2_i32 : i32 to vector<1x128xi32>
    %54 = arith.cmpi eq, %39, %53 : vector<1x128xi32>
    %55 = arith.index_cast %arg0 : i32 to index
    %c2 = arith.constant 2 : index
    %56 = memref.load %arg2[%55, %c2] : memref<2x32xf32, #tpu.memory_space<smem>>
    %57 = vector.broadcast %56 : f32 to vector<1x128xf32>
    %58 = arith.select %54, %57, %52 : vector<1x128xi1>, vector<1x128xf32>
    %c3_i32 = arith.constant 3 : i32
    %59 = vector.broadcast %c3_i32 : i32 to vector<1x128xi32>
    %60 = arith.cmpi eq, %39, %59 : vector<1x128xi32>
    %61 = arith.index_cast %arg0 : i32 to index
    %c3 = arith.constant 3 : index
    %62 = memref.load %arg2[%61, %c3] : memref<2x32xf32, #tpu.memory_space<smem>>
    %63 = vector.broadcast %62 : f32 to vector<1x128xf32>
    %64 = arith.select %60, %63, %58 : vector<1x128xi1>, vector<1x128xf32>
    %c4_i32 = arith.constant 4 : i32
    %65 = vector.broadcast %c4_i32 : i32 to vector<1x128xi32>
    %66 = arith.cmpi eq, %39, %65 : vector<1x128xi32>
    %67 = arith.index_cast %arg0 : i32 to index
    %c4 = arith.constant 4 : index
    %68 = memref.load %arg2[%67, %c4] : memref<2x32xf32, #tpu.memory_space<smem>>
    %69 = vector.broadcast %68 : f32 to vector<1x128xf32>
    %70 = arith.select %66, %69, %64 : vector<1x128xi1>, vector<1x128xf32>
    %c5_i32 = arith.constant 5 : i32
    %71 = vector.broadcast %c5_i32 : i32 to vector<1x128xi32>
    %72 = arith.cmpi eq, %39, %71 : vector<1x128xi32>
    %73 = arith.index_cast %arg0 : i32 to index
    %c5 = arith.constant 5 : index
    %74 = memref.load %arg2[%73, %c5] : memref<2x32xf32, #tpu.memory_space<smem>>
    %75 = vector.broadcast %74 : f32 to vector<1x128xf32>
    %76 = arith.select %72, %75, %70 : vector<1x128xi1>, vector<1x128xf32>
    %c6_i32 = arith.constant 6 : i32
    %77 = vector.broadcast %c6_i32 : i32 to vector<1x128xi32>
    %78 = arith.cmpi eq, %39, %77 : vector<1x128xi32>
    %79 = arith.index_cast %arg0 : i32 to index
    %c6 = arith.constant 6 : index
    %80 = memref.load %arg2[%79, %c6] : memref<2x32xf32, #tpu.memory_space<smem>>
    %81 = vector.broadcast %80 : f32 to vector<1x128xf32>
    %82 = arith.select %78, %81, %76 : vector<1x128xi1>, vector<1x128xf32>
    %c7_i32_11 = arith.constant 7 : i32
    %83 = vector.broadcast %c7_i32_11 : i32 to vector<1x128xi32>
    %84 = arith.cmpi eq, %39, %83 : vector<1x128xi32>
    %85 = arith.index_cast %arg0 : i32 to index
    %c7 = arith.constant 7 : index
    %86 = memref.load %arg2[%85, %c7] : memref<2x32xf32, #tpu.memory_space<smem>>
    %87 = vector.broadcast %86 : f32 to vector<1x128xf32>
    %88 = arith.select %84, %87, %82 : vector<1x128xi1>, vector<1x128xf32>
    %c8_i32_12 = arith.constant 8 : i32
    %89 = vector.broadcast %c8_i32_12 : i32 to vector<1x128xi32>
    %90 = arith.cmpi eq, %39, %89 : vector<1x128xi32>
    %91 = arith.index_cast %arg0 : i32 to index
    %c8 = arith.constant 8 : index
    %92 = memref.load %arg2[%91, %c8] : memref<2x32xf32, #tpu.memory_space<smem>>
    %93 = vector.broadcast %92 : f32 to vector<1x128xf32>
    %94 = arith.select %90, %93, %88 : vector<1x128xi1>, vector<1x128xf32>
    %c9_i32 = arith.constant 9 : i32
    %95 = vector.broadcast %c9_i32 : i32 to vector<1x128xi32>
    %96 = arith.cmpi eq, %39, %95 : vector<1x128xi32>
    %97 = arith.index_cast %arg0 : i32 to index
    %c9 = arith.constant 9 : index
    %98 = memref.load %arg2[%97, %c9] : memref<2x32xf32, #tpu.memory_space<smem>>
    %99 = vector.broadcast %98 : f32 to vector<1x128xf32>
    %100 = arith.select %96, %99, %94 : vector<1x128xi1>, vector<1x128xf32>
    %c10_i32 = arith.constant 10 : i32
    %101 = vector.broadcast %c10_i32 : i32 to vector<1x128xi32>
    %102 = arith.cmpi eq, %39, %101 : vector<1x128xi32>
    %103 = arith.index_cast %arg0 : i32 to index
    %c10 = arith.constant 10 : index
    %104 = memref.load %arg2[%103, %c10] : memref<2x32xf32, #tpu.memory_space<smem>>
    %105 = vector.broadcast %104 : f32 to vector<1x128xf32>
    %106 = arith.select %102, %105, %100 : vector<1x128xi1>, vector<1x128xf32>
    %c11_i32 = arith.constant 11 : i32
    %107 = vector.broadcast %c11_i32 : i32 to vector<1x128xi32>
    %108 = arith.cmpi eq, %39, %107 : vector<1x128xi32>
    %109 = arith.index_cast %arg0 : i32 to index
    %c11 = arith.constant 11 : index
    %110 = memref.load %arg2[%109, %c11] : memref<2x32xf32, #tpu.memory_space<smem>>
    %111 = vector.broadcast %110 : f32 to vector<1x128xf32>
    %112 = arith.select %108, %111, %106 : vector<1x128xi1>, vector<1x128xf32>
    %c12_i32 = arith.constant 12 : i32
    %113 = vector.broadcast %c12_i32 : i32 to vector<1x128xi32>
    %114 = arith.cmpi eq, %39, %113 : vector<1x128xi32>
    %115 = arith.index_cast %arg0 : i32 to index
    %c12 = arith.constant 12 : index
    %116 = memref.load %arg2[%115, %c12] : memref<2x32xf32, #tpu.memory_space<smem>>
    %117 = vector.broadcast %116 : f32 to vector<1x128xf32>
    %118 = arith.select %114, %117, %112 : vector<1x128xi1>, vector<1x128xf32>
    %c13_i32 = arith.constant 13 : i32
    %119 = vector.broadcast %c13_i32 : i32 to vector<1x128xi32>
    %120 = arith.cmpi eq, %39, %119 : vector<1x128xi32>
    %121 = arith.index_cast %arg0 : i32 to index
    %c13 = arith.constant 13 : index
    %122 = memref.load %arg2[%121, %c13] : memref<2x32xf32, #tpu.memory_space<smem>>
    %123 = vector.broadcast %122 : f32 to vector<1x128xf32>
    %124 = arith.select %120, %123, %118 : vector<1x128xi1>, vector<1x128xf32>
    %c14_i32 = arith.constant 14 : i32
    %125 = vector.broadcast %c14_i32 : i32 to vector<1x128xi32>
    %126 = arith.cmpi eq, %39, %125 : vector<1x128xi32>
    %127 = arith.index_cast %arg0 : i32 to index
    %c14 = arith.constant 14 : index
    %128 = memref.load %arg2[%127, %c14] : memref<2x32xf32, #tpu.memory_space<smem>>
    %129 = vector.broadcast %128 : f32 to vector<1x128xf32>
    %130 = arith.select %126, %129, %124 : vector<1x128xi1>, vector<1x128xf32>
    %c15_i32_13 = arith.constant 15 : i32
    %131 = vector.broadcast %c15_i32_13 : i32 to vector<1x128xi32>
    %132 = arith.cmpi eq, %39, %131 : vector<1x128xi32>
    %133 = arith.index_cast %arg0 : i32 to index
    %c15 = arith.constant 15 : index
    %134 = memref.load %arg2[%133, %c15] : memref<2x32xf32, #tpu.memory_space<smem>>
    %135 = vector.broadcast %134 : f32 to vector<1x128xf32>
    %136 = arith.select %132, %135, %130 : vector<1x128xi1>, vector<1x128xf32>
    %c16_i32_14 = arith.constant 16 : i32
    %137 = vector.broadcast %c16_i32_14 : i32 to vector<1x128xi32>
    %138 = arith.cmpi eq, %39, %137 : vector<1x128xi32>
    %139 = arith.index_cast %arg0 : i32 to index
    %c16 = arith.constant 16 : index
    %140 = memref.load %arg2[%139, %c16] : memref<2x32xf32, #tpu.memory_space<smem>>
    %141 = vector.broadcast %140 : f32 to vector<1x128xf32>
    %142 = arith.select %138, %141, %136 : vector<1x128xi1>, vector<1x128xf32>
    %c17_i32 = arith.constant 17 : i32
    %143 = vector.broadcast %c17_i32 : i32 to vector<1x128xi32>
    %144 = arith.cmpi eq, %39, %143 : vector<1x128xi32>
    %145 = arith.index_cast %arg0 : i32 to index
    %c17 = arith.constant 17 : index
    %146 = memref.load %arg2[%145, %c17] : memref<2x32xf32, #tpu.memory_space<smem>>
    %147 = vector.broadcast %146 : f32 to vector<1x128xf32>
    %148 = arith.select %144, %147, %142 : vector<1x128xi1>, vector<1x128xf32>
    %c18_i32 = arith.constant 18 : i32
    %149 = vector.broadcast %c18_i32 : i32 to vector<1x128xi32>
    %150 = arith.cmpi eq, %39, %149 : vector<1x128xi32>
    %151 = arith.index_cast %arg0 : i32 to index
    %c18 = arith.constant 18 : index
    %152 = memref.load %arg2[%151, %c18] : memref<2x32xf32, #tpu.memory_space<smem>>
    %153 = vector.broadcast %152 : f32 to vector<1x128xf32>
    %154 = arith.select %150, %153, %148 : vector<1x128xi1>, vector<1x128xf32>
    %c19_i32 = arith.constant 19 : i32
    %155 = vector.broadcast %c19_i32 : i32 to vector<1x128xi32>
    %156 = arith.cmpi eq, %39, %155 : vector<1x128xi32>
    %157 = arith.index_cast %arg0 : i32 to index
    %c19 = arith.constant 19 : index
    %158 = memref.load %arg2[%157, %c19] : memref<2x32xf32, #tpu.memory_space<smem>>
    %159 = vector.broadcast %158 : f32 to vector<1x128xf32>
    %160 = arith.select %156, %159, %154 : vector<1x128xi1>, vector<1x128xf32>
    %c20_i32 = arith.constant 20 : i32
    %161 = vector.broadcast %c20_i32 : i32 to vector<1x128xi32>
    %162 = arith.cmpi eq, %39, %161 : vector<1x128xi32>
    %163 = arith.index_cast %arg0 : i32 to index
    %c20 = arith.constant 20 : index
    %164 = memref.load %arg2[%163, %c20] : memref<2x32xf32, #tpu.memory_space<smem>>
    %165 = vector.broadcast %164 : f32 to vector<1x128xf32>
    %166 = arith.select %162, %165, %160 : vector<1x128xi1>, vector<1x128xf32>
    %c21_i32 = arith.constant 21 : i32
    %167 = vector.broadcast %c21_i32 : i32 to vector<1x128xi32>
    %168 = arith.cmpi eq, %39, %167 : vector<1x128xi32>
    %169 = arith.index_cast %arg0 : i32 to index
    %c21 = arith.constant 21 : index
    %170 = memref.load %arg2[%169, %c21] : memref<2x32xf32, #tpu.memory_space<smem>>
    %171 = vector.broadcast %170 : f32 to vector<1x128xf32>
    %172 = arith.select %168, %171, %166 : vector<1x128xi1>, vector<1x128xf32>
    %c22_i32 = arith.constant 22 : i32
    %173 = vector.broadcast %c22_i32 : i32 to vector<1x128xi32>
    %174 = arith.cmpi eq, %39, %173 : vector<1x128xi32>
    %175 = arith.index_cast %arg0 : i32 to index
    %c22 = arith.constant 22 : index
    %176 = memref.load %arg2[%175, %c22] : memref<2x32xf32, #tpu.memory_space<smem>>
    %177 = vector.broadcast %176 : f32 to vector<1x128xf32>
    %178 = arith.select %174, %177, %172 : vector<1x128xi1>, vector<1x128xf32>
    %c23_i32 = arith.constant 23 : i32
    %179 = vector.broadcast %c23_i32 : i32 to vector<1x128xi32>
    %180 = arith.cmpi eq, %39, %179 : vector<1x128xi32>
    %181 = arith.index_cast %arg0 : i32 to index
    %c23 = arith.constant 23 : index
    %182 = memref.load %arg2[%181, %c23] : memref<2x32xf32, #tpu.memory_space<smem>>
    %183 = vector.broadcast %182 : f32 to vector<1x128xf32>
    %184 = arith.select %180, %183, %178 : vector<1x128xi1>, vector<1x128xf32>
    %c24_i32 = arith.constant 24 : i32
    %185 = vector.broadcast %c24_i32 : i32 to vector<1x128xi32>
    %186 = arith.cmpi eq, %39, %185 : vector<1x128xi32>
    %187 = arith.index_cast %arg0 : i32 to index
    %c24 = arith.constant 24 : index
    %188 = memref.load %arg2[%187, %c24] : memref<2x32xf32, #tpu.memory_space<smem>>
    %189 = vector.broadcast %188 : f32 to vector<1x128xf32>
    %190 = arith.select %186, %189, %184 : vector<1x128xi1>, vector<1x128xf32>
    %c25_i32 = arith.constant 25 : i32
    %191 = vector.broadcast %c25_i32 : i32 to vector<1x128xi32>
    %192 = arith.cmpi eq, %39, %191 : vector<1x128xi32>
    %193 = arith.index_cast %arg0 : i32 to index
    %c25 = arith.constant 25 : index
    %194 = memref.load %arg2[%193, %c25] : memref<2x32xf32, #tpu.memory_space<smem>>
    %195 = vector.broadcast %194 : f32 to vector<1x128xf32>
    %196 = arith.select %192, %195, %190 : vector<1x128xi1>, vector<1x128xf32>
    %c26_i32 = arith.constant 26 : i32
    %197 = vector.broadcast %c26_i32 : i32 to vector<1x128xi32>
    %198 = arith.cmpi eq, %39, %197 : vector<1x128xi32>
    %199 = arith.index_cast %arg0 : i32 to index
    %c26 = arith.constant 26 : index
    %200 = memref.load %arg2[%199, %c26] : memref<2x32xf32, #tpu.memory_space<smem>>
    %201 = vector.broadcast %200 : f32 to vector<1x128xf32>
    %202 = arith.select %198, %201, %196 : vector<1x128xi1>, vector<1x128xf32>
    %c27_i32 = arith.constant 27 : i32
    %203 = vector.broadcast %c27_i32 : i32 to vector<1x128xi32>
    %204 = arith.cmpi eq, %39, %203 : vector<1x128xi32>
    %205 = arith.index_cast %arg0 : i32 to index
    %c27 = arith.constant 27 : index
    %206 = memref.load %arg2[%205, %c27] : memref<2x32xf32, #tpu.memory_space<smem>>
    %207 = vector.broadcast %206 : f32 to vector<1x128xf32>
    %208 = arith.select %204, %207, %202 : vector<1x128xi1>, vector<1x128xf32>
    %c28_i32 = arith.constant 28 : i32
    %209 = vector.broadcast %c28_i32 : i32 to vector<1x128xi32>
    %210 = arith.cmpi eq, %39, %209 : vector<1x128xi32>
    %211 = arith.index_cast %arg0 : i32 to index
    %c28 = arith.constant 28 : index
    %212 = memref.load %arg2[%211, %c28] : memref<2x32xf32, #tpu.memory_space<smem>>
    %213 = vector.broadcast %212 : f32 to vector<1x128xf32>
    %214 = arith.select %210, %213, %208 : vector<1x128xi1>, vector<1x128xf32>
    %c29_i32 = arith.constant 29 : i32
    %215 = vector.broadcast %c29_i32 : i32 to vector<1x128xi32>
    %216 = arith.cmpi eq, %39, %215 : vector<1x128xi32>
    %217 = arith.index_cast %arg0 : i32 to index
    %c29 = arith.constant 29 : index
    %218 = memref.load %arg2[%217, %c29] : memref<2x32xf32, #tpu.memory_space<smem>>
    %219 = vector.broadcast %218 : f32 to vector<1x128xf32>
    %220 = arith.select %216, %219, %214 : vector<1x128xi1>, vector<1x128xf32>
    %c30_i32 = arith.constant 30 : i32
    %221 = vector.broadcast %c30_i32 : i32 to vector<1x128xi32>
    %222 = arith.cmpi eq, %39, %221 : vector<1x128xi32>
    %223 = arith.index_cast %arg0 : i32 to index
    %c30 = arith.constant 30 : index
    %224 = memref.load %arg2[%223, %c30] : memref<2x32xf32, #tpu.memory_space<smem>>
    %225 = vector.broadcast %224 : f32 to vector<1x128xf32>
    %226 = arith.select %222, %225, %220 : vector<1x128xi1>, vector<1x128xf32>
    %c31_i32 = arith.constant 31 : i32
    %227 = vector.broadcast %c31_i32 : i32 to vector<1x128xi32>
    %228 = arith.cmpi eq, %39, %227 : vector<1x128xi32>
    %229 = arith.index_cast %arg0 : i32 to index
    %c31 = arith.constant 31 : index
    %230 = memref.load %arg2[%229, %c31] : memref<2x32xf32, #tpu.memory_space<smem>>
    %231 = vector.broadcast %230 : f32 to vector<1x128xf32>
    %232 = arith.select %228, %231, %226 : vector<1x128xi1>, vector<1x128xf32>
    %233 = tpu.iota {dimensions = array<i32: 0>} : vector<8x128xi32>
    %234 = vector.shape_cast %232 : vector<1x128xf32> to vector<1x128xf32>
    %235 = vector.broadcast %234 : vector<1x128xf32> to vector<8x128xf32>
    %c1_i32_15 = arith.constant 1 : i32
    %236 = vector.broadcast %c1_i32_15 : i32 to vector<8x128xi32>
    %237 = arith.andi %233, %236 : vector<8x128xi32>
    %c0_i32_16 = arith.constant 0 : i32
    %238 = vector.broadcast %c0_i32_16 : i32 to vector<8x128xi32>
    %239 = arith.cmpi ne, %237, %238 : vector<8x128xi32>
    %c1_i32_17 = arith.constant 1 : i32
    %240 = tpu.dynamic_rotate %235 by %c1_i32_17 dim 1 : vector<8x128xf32>, i32 -> vector<8x128xf32>
    %241 = arith.select %239, %240, %235 : vector<8x128xi1>, vector<8x128xf32>
    %c2_i32_18 = arith.constant 2 : i32
    %242 = vector.broadcast %c2_i32_18 : i32 to vector<8x128xi32>
    %243 = arith.andi %233, %242 : vector<8x128xi32>
    %c0_i32_19 = arith.constant 0 : i32
    %244 = vector.broadcast %c0_i32_19 : i32 to vector<8x128xi32>
    %245 = arith.cmpi ne, %243, %244 : vector<8x128xi32>
    %c2_i32_20 = arith.constant 2 : i32
    %246 = tpu.dynamic_rotate %241 by %c2_i32_20 dim 1 : vector<8x128xf32>, i32 -> vector<8x128xf32>
    %247 = arith.select %245, %246, %241 : vector<8x128xi1>, vector<8x128xf32>
    %c4_i32_21 = arith.constant 4 : i32
    %248 = vector.broadcast %c4_i32_21 : i32 to vector<8x128xi32>
    %249 = arith.andi %233, %248 : vector<8x128xi32>
    %c0_i32_22 = arith.constant 0 : i32
    %250 = vector.broadcast %c0_i32_22 : i32 to vector<8x128xi32>
    %251 = arith.cmpi ne, %249, %250 : vector<8x128xi32>
    %c4_i32_23 = arith.constant 4 : i32
    %252 = tpu.dynamic_rotate %247 by %c4_i32_23 dim 1 : vector<8x128xf32>, i32 -> vector<8x128xf32>
    %253 = arith.select %251, %252, %247 : vector<8x128xi1>, vector<8x128xf32>
    %c0_24 = arith.constant 0 : index
    %c0_25 = arith.constant 0 : index
    %254 = vector.load %arg4[%c0_24, %c0_25] : memref<8x128xf32, #tpu.memory_space<vmem>>, vector<8x128xf32>
    tpu.vector_store %arg4[%c0_24, %c0_25], %253 {strides = array<i32>} : memref<8x128xf32, #tpu.memory_space<vmem>>, vector<8x128xf32>,
    %c0_26 = arith.constant 0 : index
    %c0_27 = arith.constant 0 : index
    %255 = vector.load %arg4[%c0_26, %c0_27] : memref<8x128xf32, #tpu.memory_space<vmem>>, vector<8x8xf32>
    %c0_28 = arith.constant 0 : index
    %c0_29 = arith.constant 0 : index
    %256 = vector.load %arg3[%c0_28, %c0_29] : memref<8x8xf32, #tpu.memory_space<vmem>>, vector<8x8xf32>
    tpu.vector_store %arg3[%c0_28, %c0_29], %255 {strides = array<i32>} : memref<8x8xf32, #tpu.memory_space<vmem>>, vector<8x8xf32>,
    return
  }
  func.func @transform_0(%arg0: i32, %arg1: i32) -> (i32, i32) {
    %c0_i32 = arith.constant 0 : i32
    %c0_i32_0 = arith.constant 0 : i32
    %c0_i32_1 = arith.constant 0 : i32
    return %c0_i32, %c0_i32_0 : i32, i32
  }
  func.func @transform_1(%arg0: i32, %arg1: i32) -> (i32, i32) {
    %c1_i32 = arith.constant 1 : i32
    %0 = arith.muli %arg0, %c1_i32 : i32
    %1 = arith.addi %0, %arg1 : i32
    %c0_i32 = arith.constant 0 : i32
    %c0_i32_0 = arith.constant 0 : i32
    return %1, %c0_i32 : i32, i32
  }
}

</mosaic_0001>

<bundles_post_ra>
// kernel: tpu_custom_call.1
= control target key start
LH: loop header
LB: loop body
LE: loop exit
PB: predicated region body
PF: predicated region fallthrough
CT: control target
= control target key end

     0   :  { %6 = vsyncpa [#allocation4], 0  ;;  %s511_s6 = smov 0   ;;  %s513_s7 = smov 0   ;;  %s710_s0 = inlined_call_operand.hbm [shape: f32[2,32], index: 0, kind: input, shape index: {}]   ;;  %s711_s1 = inlined_call_operand.vmem [shape: f32[16,8], index: 1, kind: output, shape index: {}]  }
   0x1   :  { %s515_s8 = smov 0  }
   0x2 LB: > { %s401_s9 = sadd.s32 4294967295, %s494_s8   ;;  %s24_s10 = sadd.s32 1, %s490_s7  ;;  %s494_s8 = sphi %s515_s8, %s12_s8   ;;  %s490_s7 = sphi %s513_s7, %s713_s7   ;;  %s486_s6 = sphi %s511_s6, %s712_s6  }
   0x3   : > { %p26_p0 = scmp.ge.s32.totalorder %s24_s10, 2  ;;  %p403_p1 = scmp.ge.s32.totalorder %s494_s8, 1 }
   0x4   : > { %p78_p2 = scmp.lt.s32.totalorder %s494_s8, 3  ;;  %p424_p4 = scmp.eq.s32.totalorder %s401_s9, 0 }
   0x5   : > { %s715_s10 = smov (%p26_p0, %s24_s10), 0  ;;  %s496_s11 = smov [#allocation3]  }
   0x6   : > { %p79_p3 = pnand %p403_p1, %p78_p2 }
   0x8   : > { %p420_p5 = pneg %p79_p3  ;;  %102 = sbr.rel (%p79_p3) target bundleno = 452 (0x1c4), region = 24 }
   0xa   : > { %p421_p6 = pnand %p424_p4, %p420_p5 }
   0xc   : > { %423 = dma.hbm_to_smem (!%p421_p6), %s710_s0, 32, %s496_s11, [#allocation4]  }
   0xd   : > { %481 = dma.done.wait (%p424_p4), [#allocation4], 32  }
   0xe   : > { %483 = vsyncadd (%p424_p4), [#allocation4], 4294967264 }
   0xf   : > { %108 = sfence }
  0x10   : > { %v125_v0 = vlaneseq  ;;  %s537_s14 = sshll.u32 %s486_s6, 7  ;;  %v497_v19 = vmov 0   ;;  %p119_p7 = scmp.lt.s32.totalorder %s486_s6, 1 }
  0x11   : > { %s161_s15 = sadd.s32 1, %s537_s14  ;;  %s166_s16 = sadd.s32 2, %s537_s14 }
  0x12   : > { %v126_v1 = vand.u32 127, %v125_v0  ;;  %s542_s17 = sld [smem:[#allocation3 + %s537_s14]]  ;;  %s171_s18 = sadd.s32 3, %s537_s14 }
  0x13   : > { %s545_s19 = sld [smem:[#allocation3 + %s161_s15]]  ;;  %s176_s20 = sadd.s32 4, %s537_s14 }
  0x14   : > { %v127_v2 = vadd.s32 7, %v126_v1  ;;  %s548_s21 = sld [smem:[#allocation3 + %s166_s16]]  ;;  %s181_s22 = sadd.s32 5, %s537_s14 }
  0x15   : > { %s551_s23 = sld [smem:[#allocation3 + %s171_s18]]  ;;  %s186_s24 = sadd.s32 6, %s537_s14 }
  0x16   : > { %vm128_vm0 = vcmp.ge.s32.totalorder %v127_v2, 128  ;;  %v408_v3 = vadd.s32 4294967168, %v127_v2  ;;  %s554_s25 = sld [smem:[#allocation3 + %s176_s20]]  ;;  %s191_s26 = sadd.s32 7, %s537_s14 }
  0x17   : > { %s557_s27 = sld [smem:[#allocation3 + %s181_s22]]  ;;  %s196_s28 = sadd.s32 8, %s537_s14 }
  0x18   : > { %v130_v4 = vsel %vm128_vm0, %v408_v3, %v127_v2  ;;  %s560_s29 = sld [smem:[#allocation3 + %s186_s24]]  ;;  %s201_s30 = sadd.s32 9, %s537_s14  ;;  %v158_v24 = vstv %s542_s17 }
  0x19   : > { %v409_v5 = vadd.s32 4294967289, %v130_v4  ;;  %s563_s2 = sld [smem:[#allocation3 + %s191_s26]]  ;;  %s206_s3 = sadd.s32 10, %s537_s14  ;;  %v163_v25 = vstv %s545_s19 }
  0x1a   : > { %s569_s4 = sld [smem:[#allocation3 + %s196_s28]]  ;;  %s211_s5 = sadd.s32 11, %s537_s14  ;;  %v168_v26 = vstv %s548_s21 }
  0x1b   : > { %v134_v6 = vsub.s32 0, %v409_v5  ;;  %s573_s9 = sld [smem:[#allocation3 + %s201_s30]]  ;;  %s216_s11 = sadd.s32 12, %s537_s14  ;;  %v173_v28 = vstv %s551_s23 }
  0x1c   : > { %s580_s12 = sld [smem:[#allocation3 + %s206_s3]]  ;;  %s221_s13 = sadd.s32 13, %s537_s14  ;;  %v178_v30 = vstv %s554_s25 }
  0x1d   : > { %v137_v7 = vsub.s32 0, %v134_v6  ;;  %vm135_vm1 = vcmp.lt.s32.totalorder %v134_v6, 0  ;;  %s585_s15 = sld [smem:[#allocation3 + %s211_s5]]  ;;  %s226_s16 = sadd.s32 14, %s537_s14  ;;  %v183_v32 = vstv %s557_s27 }
  0x1e   : > { %v136_v20 = vsel %vm135_vm1, 16, %v497_v19  ;;  %s590_s17 = sld [smem:[#allocation3 + %s216_s11]]  ;;  %s231_s18 = sadd.s32 15, %s537_s14  ;;  %v188_v34 = vstv %s560_s29 }
  0x1f   : > { %v410_v8 = vmin.u32 %v137_v7, %v134_v6  ;;  %s595_s19 = sld [smem:[#allocation3 + %s221_s13]]  ;;  %s236_s20 = sadd.s32 16, %s537_s14  ;;  %v193_v36 = vstv %s563_s2 }
  0x20   : > { %s600_s21 = sld [smem:[#allocation3 + %s226_s16]]  ;;  %s241_s22 = sadd.s32 17, %s537_s14  ;;  %v198_v38 = vstv %s569_s4 }
  0x21   : > { %v140_v9 = vcvt.s32.f32 %v410_v8  ;;  %vm139_vm2 = vcmp.lt.s32.totalorder %v410_v8, 8  ;;  %s605_s23 = sld [smem:[#allocation3 + %s231_s18]]  ;;  %s246_s24 = sadd.s32 18, %s537_s14  ;;  %v203_v40 = vstv %s573_s9 }
  0x22   : > { %s610_s25 = sld [smem:[#allocation3 + %s236_s20]]  ;;  %s251_s26 = sadd.s32 19, %s537_s14  ;;  %v208_v42 = vstv %s580_s12 }
  0x23   : > { %v141_v10 = vmax.f32 %v140_v9, 1.0  ;;  %s615_s27 = sld [smem:[#allocation3 + %s241_s22]]  ;;  %s256_s28 = sadd.s32 20, %s537_s14  ;;  %v213_v44 = vstv %s585_s15 }
  0x24   : > { %s620_s29 = sld [smem:[#allocation3 + %s246_s24]]  ;;  %s261_s30 = sadd.s32 21, %s537_s14  ;;  %v218_v46 = vstv %s590_s17 }
  0x25   : > { %v143_v11 = vmul.f32 0.125, %v141_v10  ;;  %s625_s2 = sld [smem:[#allocation3 + %s251_s26]]  ;;  %s266_s3 = sadd.s32 22, %s537_s14  ;;  %v223_v48 = vstv %s595_s19 }
  0x26   : > { %s630_s4 = sld [smem:[#allocation3 + %s256_s28]]  ;;  %s271_s5 = sadd.s32 23, %s537_s14  ;;  %v228_v50 = vstv %s600_s21 }
  0x27   : > { %455 = vlog2.f32 %v143_v11  ;;  %s635_s9 = sld [smem:[#allocation3 + %s261_s30]]  ;;  %s276_s11 = sadd.s32 24, %s537_s14  ;;  %v233_v52 = vstv %s605_s23 }
  0x28   : > { %s640_s12 = sld [smem:[#allocation3 + %s266_s3]]  ;;  %s281_s13 = sadd.s32 25, %s537_s14  ;;  %v238_v54 = vstv %s610_s25 }
  0x29   : > { %s645_s15 = sld [smem:[#allocation3 + %s271_s5]]  ;;  %s286_s16 = sadd.s32 26, %s537_s14  ;;  %v243_v56 = vstv %s615_s27 }
  0x2a   : > { %s650_s17 = sld [smem:[#allocation3 + %s276_s11]]  ;;  %s291_s18 = sadd.s32 27, %s537_s14  ;;  %v248_v58 = vstv %s620_s29 }
  0x2b   : > { %s655_s19 = sld [smem:[#allocation3 + %s281_s13]]  ;;  %s296_s20 = sadd.s32 28, %s537_s14  ;;  %v253_v60 = vstv %s625_s2 }
  0x2c   : > { %s660_s21 = sld [smem:[#allocation3 + %s286_s16]]  ;;  %s301_s22 = sadd.s32 29, %s537_s14  ;;  %v258_v62 = vstv %s630_s4 }
  0x2d   : > { %s665_s23 = sld [smem:[#allocation3 + %s291_s18]]  ;;  %s306_s24 = sadd.s32 30, %s537_s14  ;;  %v263_v1 = vstv %s635_s9 }
  0x2e   : > { %s670_s25 = sld [smem:[#allocation3 + %s296_s20]]  ;;  %s311_s26 = sadd.s32 31, %s537_s14  ;;  %v268_v3 = vstv %s640_s12 }
  0x2f   : > { %s675_s27 = sld [smem:[#allocation3 + %s301_s22]]  ;;  %v273_v5 = vstv %s645_s15  ;;  %s498_s29 = smov 1  }
  0x30   : > { %s307_s28 = sld [smem:[#allocation3 + %s306_s24]]  ;;  %v278_v7 = vstv %s650_s17  ;;  %s499_s30 = smov 2  }
  0x31   : > { %s312_s14 = sld [smem:[#allocation3 + %s311_s26]]  ;;  %v283_v9 = vstv %s655_s19  ;;  %s500_s2 = smov 4  }
  0x32   : > { %v288_v11 = vstv %s660_s21  ;;  %s717_s6 = smov (!%p119_p7, %s486_s6), 1 }
  0x33   : > { %s407_s3 = sshll.u32 %s717_s6, 3 }
  0x34   : > { %v456_v12 = vpop.eup %455  ;;  %s122_s9 = scalar_lea.vmem %s711_s1, %s407_s3 }
  0x35   : > { %v145_v13 = vmul.f32 0.6931472, %v456_v12 }
  0x36   : > { %v308_v19 = vstv %s307_s28 }
  0x37   : > { %v147_v14 = vmul.f32 0.36067376, %v145_v13  ;;  %v293_v13 = vstv %s665_s23 }
  0x39   : > { %v148_v15 = vmul.f32 8.0, %v147_v14 }
  0x3b   : > { %v414_v16 = vtrunc.f32 %v148_v15  ;;  %v298_v15 = vstv %s670_s25 }
  0x3d   : > { %v415_v17 = vcvt.f32.s32 %v414_v16 }
  0x3f   : > { %v150_v18 = vadd.s32 8, %v415_v17  ;;  %v303_v17 = vstv %s675_s27 }
  0x41   : > { %vm151_vm3 = vcmp.lt.s32.totalorder %v150_v18, 15 }
  0x42   : > { %v152_v21 = vsel %vm151_vm3, %v150_v18, 15 }
  0x43   : > { %v153_v22 = vsel %vm139_vm2, %v410_v8, %v152_v21  ;;  %v313_v21 = vstv %s312_s14 }
  0x44   : > { %v566_v23 = vadd.s32 %v153_v22, %v136_v20 }
  0x46   : > { %vm155_vm4 = vcmp.eq.s32.totalorder %v566_v23, 0  ;;  %vm160_vm5 = vcmp.eq.s32.totalorder %v566_v23, 1  ;;  %vm165_vm6 = vcmp.eq.s32.totalorder %v566_v23, 2  ;;  %vm170_vm7 = vcmp.eq.s32.totalorder %v566_v23, 3 }
  0x47   : > { %v159_v27 = vsel %vm155_vm4, %v158_v24, 0.0  ;;  %vm175_vm8 = vcmp.eq.s32.totalorder %v566_v23, 4  ;;  %vm180_vm9 = vcmp.eq.s32.totalorder %v566_v23, 5  ;;  %vm185_vm10 = vcmp.eq.s32.totalorder %v566_v23, 6 }
  0x48   : > { %v164_v29 = vsel %vm160_vm5, %v163_v25, %v159_v27  ;;  %vm190_vm11 = vcmp.eq.s32.totalorder %v566_v23, 7  ;;  %vm195_vm12 = vcmp.eq.s32.totalorder %v566_v23, 8  ;;  %vm200_vm13 = vcmp.eq.s32.totalorder %v566_v23, 9 }
  0x49   : > { %v169_v31 = vsel %vm165_vm6, %v168_v26, %v164_v29  ;;  %vm205_vm14 = vcmp.eq.s32.totalorder %v566_v23, 10  ;;  %vm210_vm15 = vcmp.eq.s32.totalorder %v566_v23, 11  ;;  %vm215_vm0 = vcmp.eq.s32.totalorder %v566_v23, 12 }
  0x4a   : > { %v174_v33 = vsel %vm170_vm7, %v173_v28, %v169_v31  ;;  %vm220_vm1 = vcmp.eq.s32.totalorder %v566_v23, 13  ;;  %vm225_vm2 = vcmp.eq.s32.totalorder %v566_v23, 14  ;;  %vm230_vm3 = vcmp.eq.s32.totalorder %v566_v23, 15 }
  0x4b   : > { %v179_v35 = vsel %vm175_vm8, %v178_v30, %v174_v33  ;;  %vm235_vm4 = vcmp.eq.s32.totalorder %v566_v23, 16  ;;  %vm240_vm5 = vcmp.eq.s32.totalorder %v566_v23, 17  ;;  %vm245_vm6 = vcmp.eq.s32.totalorder %v566_v23, 18 }
  0x4c   : > { %v184_v37 = vsel %vm180_vm9, %v183_v32, %v179_v35  ;;  %vm250_vm7 = vcmp.eq.s32.totalorder %v566_v23, 19  ;;  %vm255_vm8 = vcmp.eq.s32.totalorder %v566_v23, 20  ;;  %vm260_vm9 = vcmp.eq.s32.totalorder %v566_v23, 21 }
  0x4d   : > { %v189_v39 = vsel %vm185_vm10, %v188_v34, %v184_v37  ;;  %vm265_vm10 = vcmp.eq.s32.totalorder %v566_v23, 22  ;;  %v316_v26 = vshrl.u32 %v125_v0, 7 }
  0x4e   : > { %v194_v41 = vsel %vm190_vm11, %v193_v36, %v189_v39  ;;  %vm270_vm11 = vcmp.eq.s32.totalorder %v566_v23, 23 }
  0x4f   : > { %v199_v43 = vsel %vm195_vm12, %v198_v38, %v194_v41  ;;  %vm275_vm12 = vcmp.eq.s32.totalorder %v566_v23, 24  ;;  %v317_v27 = vand.u32 1, %v316_v26  ;;  %v322_v30 = vand.u32 2, %v316_v26 }
  0x50   : > { %v204_v45 = vsel %vm200_vm13, %v203_v40, %v199_v43  ;;  %vm280_vm13 = vcmp.eq.s32.totalorder %v566_v23, 25  ;;  %v327_v32 = vand.u32 4, %v316_v26 }
  0x51   : > { %v209_v47 = vsel %vm205_vm14, %v208_v42, %v204_v45  ;;  %vm285_vm14 = vcmp.eq.s32.totalorder %v566_v23, 26 }
  0x52   : > { %v214_v49 = vsel %vm210_vm15, %v213_v44, %v209_v47  ;;  %vm290_vm15 = vcmp.eq.s32.totalorder %v566_v23, 27 }
  0x53   : > { %v219_v51 = vsel %vm215_vm0, %v218_v46, %v214_v49  ;;  %vm295_vm0 = vcmp.eq.s32.totalorder %v566_v23, 28 }
  0x54   : > { %v224_v53 = vsel %vm220_vm1, %v223_v48, %v219_v51  ;;  %vm300_vm1 = vcmp.eq.s32.totalorder %v566_v23, 29 }
  0x55   : > { %v229_v55 = vsel %vm225_vm2, %v228_v50, %v224_v53  ;;  %vm305_vm2 = vcmp.eq.s32.totalorder %v566_v23, 30 }
  0x56   : > { %v234_v57 = vsel %vm230_vm3, %v233_v52, %v229_v55  ;;  %vm310_vm3 = vcmp.eq.s32.totalorder %v566_v23, 31 }
  0x57   : > { %v239_v59 = vsel %vm235_vm4, %v238_v54, %v234_v57  ;;  %vm318_vm4 = vcmp.ne.s32.totalorder %v317_v27, 0 }
  0x58   : > { %v244_v61 = vsel %vm240_vm5, %v243_v56, %v239_v59  ;;  %vm323_vm5 = vcmp.ne.s32.totalorder %v322_v30, 0 }
  0x59   : > { %v249_v63 = vsel %vm245_vm6, %v248_v58, %v244_v61  ;;  %vm328_vm6 = vcmp.ne.s32.totalorder %v327_v32, 0 }
  0x5a   : > { %v254_v2 = vsel %vm250_vm7, %v253_v60, %v249_v63  ;;  %vm334_vm7 = vcmask 64512  }
  0x5b   : > { %v259_v4 = vsel %vm255_vm8, %v258_v62, %v254_v2 }
  0x5c   : > { %v264_v6 = vsel %vm260_vm9, %v263_v1, %v259_v4 }
  0x5d   : > { %v269_v8 = vsel %vm265_vm10, %v268_v3, %v264_v6 }
  0x5e   : > { %v274_v10 = vsel %vm270_vm11, %v273_v5, %v269_v8 }
  0x5f   : > { %v279_v12 = vsel %vm275_vm12, %v278_v7, %v274_v10 }
  0x60   : > { %v284_v14 = vsel %vm280_vm13, %v283_v9, %v279_v12 }
  0x61   : > { %v289_v16 = vsel %vm285_vm14, %v288_v11, %v284_v14 }
  0x62   : > { %v294_v18 = vsel %vm290_vm15, %v293_v13, %v289_v16 }
  0x63   : > { %v299_v20 = vsel %vm295_vm0, %v298_v15, %v294_v18 }
  0x64   : > { %v304_v22 = vsel %vm300_vm1, %v303_v17, %v299_v20 }
  0x65   : > { %v309_v24 = vsel %vm305_vm2, %v308_v19, %v304_v22 }
  0x66   : > { %v314_v25 = vsel %vm310_vm3, %v313_v21, %v309_v24 }
  0x67   : > { %319 = vrot.lane.b32.xlu0 %v314_v25, %s498_s29 }
  0xd9   : > { %v320_v28 = vpop.permute.xlu0 %319 }
  0xda   : > { %v321_v29 = vsel %vm318_vm4, %v320_v28, %v314_v25 }
  0xdb   : > { %324 = vrot.lane.b32.xlu0 %v321_v29, %s499_s30 }
 0x14d   : > { %v325_v31 = vpop.permute.xlu0 %324 }
 0x14e   : > { %v326_v23 = vsel %vm323_vm5, %v325_v31, %v321_v29 }
 0x14f   : > { %329 = vrot.lane.b32.xlu1 %v326_v23, %s500_s2 }
 0x1c1   : > { %v330_v0 = vpop.permute.xlu1 %329 }
 0x1c2   : > { %v331_v33 = vsel %vm328_vm6, %v330_v0, %v326_v23 }
 0x1c3   : > { %335 = vst.msk [vmem:[%s122_s9] sm:$0xff] %vm334_vm7, %v331_v33 }
 0x1c4 PF: > { %s12_s8 = sadd.s32 1, %s494_s8   ;;  %s712_s6 = smov %s490_s7 }
 0x1c5   : > { %p9_p8 = scmp.ge.s32.totalorder %s12_s8, 4   ;;  %s713_s7 = smov %s715_s10 }
 0x1c7   :  { %11 = sbr.rel (!%p9_p8) target bundleno = 2 (0x2), region = 56 }
 0x1cc   :  { %358 = vsyncpa [#allocation4], 1 }
 0x1cd   :  { %360 = vsyncpa [#allocation4 + $0x1], 1 }

</bundles_post_ra>
